<compile_context>
chip_gen: v5e
topology: v5e:2x2
jax: 0.10.0
libtpu: 0.0.40
codegen_flags: <defaults>
</compile_context>

<pallas_src>
import functools

import jax
import jax.numpy as jnp
from jax.experimental import pallas as pl
from jax.experimental.pallas import tpu as pltpu


def _tile_budget_bytes():
    """Per-stream tile budget: ~2 MiB on v5-class chips, ~4 MiB otherwise."""
    try:
        kind = jax.devices()[0].device_kind.lower()
    except Exception:  # pragma: no cover - defensive (mock / interpret setups)
        kind = ""
    if "v5" in kind:
        return 2 * 1024 * 1024
    return 4 * 1024 * 1024


def _fold_lane_width(total, sublane, cap=2048):
    """Largest multiple-of-128 divisor of `total` (capped) that still leaves at
    least `sublane` rows; falls back to 128.  None if total % 128 != 0."""
    if total % 128 != 0:
        return None
    best = None
    lane = 128
    while lane <= min(total, cap):
        if total % lane == 0 and total // lane >= sublane:
            best = lane
        lane += 128
    return best if best is not None else 128


def _pick_row_tile(rows, row_bytes, sublane, tile_bytes, want_tiles=1):
    """Largest row tile that is a multiple of the sublane packing (or the full
    extent), keeps one tile <= tile_bytes, and yields >= want_tiles row tiles
    when possible.  Prefers exact divisors of `rows` (no masked tail)."""
    cap = max(sublane, int(tile_bytes // max(row_bytes, 1)))
    if want_tiles > 1 and rows > sublane:
        cap = min(cap, max(sublane, -(-rows // want_tiles)))  # ceil divide
    if cap >= rows:
        return rows
    cap = max(sublane, cap - cap % sublane)
    for ts in range(cap, sublane - 1, -sublane):
        if rows % ts == 0:
            return ts
    return cap  # partial last block; Pallas masks the tail


def _add_pe_kernel(x_ref, pe_ref, o_ref):
    # Eval mode (or p == 0): dropout is identity.
    o_ref[...] = (x_ref[...] + pe_ref[...]).astype(o_ref.dtype)


def _add_pe_dropout_hw_prng_kernel(seed_ref, x_ref, pe_ref, o_ref, *, threshold, scale):
    # Training path on TPU: x + pe, then inverted dropout using the on-chip
    # PRNG.  Seed mixes BOTH grid indices so masks never repeat across tiles.
    tile_id = pl.program_id(0) * pl.num_programs(1) + pl.program_id(1)
    pltpu.prng_seed(seed_ref[0] + tile_id)
    y = x_ref[...] + pe_ref[...]
    bits = pltpu.prng_random_bits(y.shape)
    if bits.dtype != jnp.uint32:
        bits = pltpu.bitcast(bits, jnp.uint32)
    keep = bits >= jnp.uint32(threshold)          # P(keep) = 1 - p
    o_ref[...] = jnp.where(keep, y * scale, 0.0).astype(o_ref.dtype)


def _add_pe_dropout_bits_kernel(x_ref, pe_ref, bits_ref, o_ref, *, threshold, scale):
    # Fallback training path (non-TPU backends): random bits are precomputed in
    # plain JAX and streamed in; same threshold comparison as the HW path.
    y = x_ref[...] + pe_ref[...]
    keep = bits_ref[...] >= jnp.uint32(threshold)
    o_ref[...] = jnp.where(keep, y * scale, 0.0).astype(o_ref.dtype)


def learned_positional_embedding(x, pe, *, p=0.0, training=False, seed=0,
                                 use_hw_prng=None):
    """x: (B, S, D), pe: (1, max_len, D). Returns dropout(x + pe[:, :S], p)."""
    if not (0.0 <= p < 1.0):
        raise ValueError(f"dropout p must be in [0, 1), got {p}")
    B, S, D = x.shape
    if pe.shape[0] != 1 or pe.shape[2] != D or pe.shape[1] < S:
        raise ValueError(f"pe shape {pe.shape} incompatible with x shape {x.shape}")

    sublane = 16 if x.dtype == jnp.bfloat16 else 8
    tile_bytes = _tile_budget_bytes()

    # ---- Choose a lane-dense 2-D (rows x lanes) view per batch element. ----
    if D % 128 == 0:
        rows, lanes = S, D
        x_k = x
        if S % sublane == 0:
            # No wrapper-side slice/convert pass over pe: pass the full table
            # and let the index_map address only the first S rows.
            pe_k = pe
        else:
            pe_k = pe[:, :S, :]  # glue slice (keeps tail masking consistent)
    else:
        lane_w = _fold_lane_width(S * D, sublane)
        if lane_w is not None:
            rows, lanes = (S * D) // lane_w, lane_w
            x_k = x.reshape(B, rows, lanes)
            pe_k = pe[:, :S, :].reshape(1, rows, lanes)
        else:
            # TODO(synk): S*D not a multiple of 128 -> last dim stays D (<128
            # lanes => masked partial stores). Rare; still correct.
            rows, lanes = S, D
            x_k = x
            pe_k = pe[:, :S, :]

    # If B == 1, prefer splitting rows into >= 2 tiles so v7x's 2nd TC has work.
    want_tiles = 1 if B >= 2 else 2
    ts = _pick_row_tile(rows, lanes * x.dtype.itemsize, sublane, tile_bytes, want_tiles)
    grid = (pl.cdiv(rows, ts), B)  # batch innermost -> pe tile stays VMEM-resident

    # `None` squeezes the leading dim: kernel sees (ts, lanes) tiles.
    x_spec = pl.BlockSpec((None, ts, lanes), lambda r, b, *_: (b, r, 0))
    pe_spec = pl.BlockSpec((None, ts, lanes), lambda r, b, *_: (0, r, 0))
    out_spec = pl.BlockSpec((None, ts, lanes), lambda r, b, *_: (b, r, 0))
    out_shape = jax.ShapeDtypeStruct(x_k.shape, x.dtype)
    cparams = pltpu.CompilerParams(
        dimension_semantics=("parallel", "parallel"),
        vmem_limit_bytes=48 * 1024 * 1024,  # covers 4 streams x 2 bufs x 4 MiB
    )

    if (not training) or p == 0.0:
        out = pl.pallas_call(
            _add_pe_kernel,
            out_shape=out_shape,
            grid_spec=pltpu.PrefetchScalarGridSpec(
                num_scalar_prefetch=0,
                grid=grid,
                in_specs=[x_spec, pe_spec],
                out_specs=out_spec,
            ),
            compiler_params=cparams,
        )(x_k, pe_k)
        return out.reshape(B, S, D)

    # Inverted dropout: drop iff bits < threshold, keep prob = 1 - p.
    threshold = min(int(round(p * 4294967296.0)), 4294967295)
    scale = 1.0 / (1.0 - p)

    if use_hw_prng is None:
        # TODO(synk): trace-time backend check; pass use_hw_prng explicitly
        # under AOT compilation / interpret-mode testing / mixed backends.
        use_hw_prng = jax.default_backend() == "tpu"

    if use_hw_prng:
        seed_arr = jnp.asarray([seed], dtype=jnp.int32)
        out = pl.pallas_call(
            functools.partial(
                _add_pe_dropout_hw_prng_kernel, threshold=threshold, scale=scale
            ),
            out_shape=out_shape,
            grid_spec=pltpu.PrefetchScalarGridSpec(
                num_scalar_prefetch=1,  # seed lands in SMEM
                grid=grid,
                in_specs=[x_spec, pe_spec],
                out_specs=out_spec,
            ),
            compiler_params=cparams,
        )(seed_arr, x_k, pe_k)
    else:
        # Non-TPU fallback: stream precomputed uint32 bits (own spec/stream).
        bits = jax.random.bits(jax.random.PRNGKey(seed), x_k.shape, jnp.uint32)
        bits_spec = pl.BlockSpec((None, ts, lanes), lambda r, b, *_: (b, r, 0))
        out = pl.pallas_call(
            functools.partial(
                _add_pe_dropout_bits_kernel, threshold=threshold, scale=scale
            ),
            out_shape=out_shape,
            grid_spec=pltpu.PrefetchScalarGridSpec(
                num_scalar_prefetch=0,
                grid=grid,
                in_specs=[x_spec, pe_spec, bits_spec],
                out_specs=out_spec,
            ),
            compiler_params=cparams,
        )(x_k, pe_k, bits)
    return out.reshape(B, S, D)


def _check_case(B, S, D, max_len, p_drop, seed_base):
    key = jax.random.PRNGKey(seed_base)
    kx, kpe = jax.random.split(key)
    x = jax.random.normal(kx, (B, S, D), dtype=jnp.float32)
    pe = jax.random.normal(kpe, (1, max_len, D), dtype=jnp.float32)
    ref = x + pe[:, :S, :]

    # Eval mode (dropout identity): exact match vs plain-JAX reference.
    out = learned_positional_embedding(x, pe, p=p_drop, training=False)
    out = jax.block_until_ready(out)
    assert out.shape == (B, S, D)
    assert jnp.allclose(out, ref, atol=1e-6, rtol=1e-6), "mismatch vs reference"

    # Training mode: surviving elements equal (x+pe)/(1-p); dropped are 0.
    out_tr = learned_positional_embedding(x, pe, p=p_drop, training=True,
                                          seed=seed_base + 123)
    out_tr = jax.block_until_ready(out_tr)
    assert out_tr.shape == (B, S, D)
    expected = ref / (1.0 - p_drop)
    kept_or_expected = jnp.where(out_tr != 0, out_tr, expected)
    assert jnp.allclose(kept_or_expected, expected, atol=1e-5, rtol=1e-5), \
        "dropout scale mismatch"


if __name__ == "__main__":
    # Small shapes consistent with the module: (B, S, D), table (1, max_len, D).
    # Case 1 exercises the folded (D % 128 != 0) path; case 2 exercises the
    # lane-aligned path where the full pe table is passed without slicing.
    _check_case(B=2, S=8, D=32, max_len=16, p_drop=0.1, seed_base=0)
    _check_case(B=2, S=16, D=128, max_len=32, p_drop=0.2, seed_base=7)
    print("KERNEL_OK")
</pallas_src>

<mosaic_0001>
module attributes {stable_mosaic.version = 11 : i64} {
  func.func @_add_pe_kernel(%arg0: i32, %arg1: i32, %arg2: memref<1x2x128xf32, #tpu.memory_space<vmem>>, %arg3: memref<1x2x128xf32, #tpu.memory_space<vmem>>, %arg4: memref<1x2x128xf32, #tpu.memory_space<vmem>>) attributes {dimension_semantics = [#tpu.dimension_semantics<parallel>, #tpu.dimension_semantics<parallel>], iteration_bounds = array<i64: 1, 2>, scalar_prefetch = 0 : i64, scratch_operands = 0 : i64, tpu.core_type = #tpu.core_type<tc>, window_params = [{transform_indices = @transform_0, window_bounds = array<i64: 1, 2, 128>}, {transform_indices = @transform_1, window_bounds = array<i64: 1, 2, 128>}, {transform_indices = @transform_2, window_bounds = array<i64: 1, 2, 128>}]} {
    %c0 = arith.constant 0 : index
    %c0_0 = arith.constant 0 : index
    %c0_1 = arith.constant 0 : index
    %0 = vector.load %arg2[%c0, %c0_0, %c0_1] : memref<1x2x128xf32, #tpu.memory_space<vmem>>, vector<1x2x128xf32>
    %1 = vector.shape_cast %0 : vector<1x2x128xf32> to vector<2x128xf32>
    %c0_2 = arith.constant 0 : index
    %c0_3 = arith.constant 0 : index
    %c0_4 = arith.constant 0 : index
    %2 = vector.load %arg3[%c0_2, %c0_3, %c0_4] : memref<1x2x128xf32, #tpu.memory_space<vmem>>, vector<1x2x128xf32>
    %3 = vector.shape_cast %2 : vector<1x2x128xf32> to vector<2x128xf32>
    %4 = arith.addf %1, %3 : vector<2x128xf32>
    %c0_5 = arith.constant 0 : index
    %c0_6 = arith.constant 0 : index
    %c0_7 = arith.constant 0 : index
    %5 = vector.load %arg4[%c0_5, %c0_6, %c0_7] : memref<1x2x128xf32, #tpu.memory_space<vmem>>, vector<1x2x128xf32>
    %6 = vector.shape_cast %5 : vector<1x2x128xf32> to vector<2x128xf32>
    %7 = vector.shape_cast %4 : vector<2x128xf32> to vector<1x2x128xf32>
    tpu.vector_store %arg4[%c0_5, %c0_6, %c0_7], %7 {strides = array<i32>} : memref<1x2x128xf32, #tpu.memory_space<vmem>>, vector<1x2x128xf32>,
    return
  }
  func.func @transform_0(%arg0: i32, %arg1: i32) -> (i32, i32, i32) {
    %c0_i32 = arith.constant 0 : i32
    %c0_i32_0 = arith.constant 0 : i32
    return %arg1, %arg0, %c0_i32 : i32, i32, i32
  }
  func.func @transform_1(%arg0: i32, %arg1: i32) -> (i32, i32, i32) {
    %c0_i32 = arith.constant 0 : i32
    %c0_i32_0 = arith.constant 0 : i32
    %c0_i32_1 = arith.constant 0 : i32
    return %c0_i32, %arg0, %c0_i32_0 : i32, i32, i32
  }
  func.func @transform_2(%arg0: i32, %arg1: i32) -> (i32, i32, i32) {
    %c0_i32 = arith.constant 0 : i32
    %c0_i32_0 = arith.constant 0 : i32
    return %arg1, %arg0, %c0_i32 : i32, i32, i32
  }
}

</mosaic_0001>

<bundles_post_ra>
// kernel: tpu_custom_call.1
= control target key start
LH: loop header
LB: loop body
LE: loop exit
PB: predicated region body
PF: predicated region fallthrough
CT: control target
= control target key end

     0   :  { %7 = vsyncpa [#allocation3], 0  ;;  %s714_s0 = inlined_call_operand.hbm [shape: f32[2,2,128], index: 0, kind: input, shape index: {}]   ;;  %s715_s1 = inlined_call_operand.hbm [shape: f32[1,2,128], index: 1, kind: input, shape index: {}]   ;;  %s716_s2 = inlined_call_operand.hbm [shape: f32[2,2,128], index: 2, kind: output, shape index: {}]  }
   0x1   :  { %9 = vsyncpa [#allocation3 + $0x1], 0 }
   0x2   :  { %10 = vsyncpa [#allocation6], 0 }
   0x3   :  { %11 = vsyncpa [#allocation4], 0 }
   0x4   :  { %13 = vsyncpa [#allocation4 + $0x1], 0  ;;  %s565_s9 = smov 0   ;;  %s567_s10 = smov 0  }
   0x5   :  { %s569_s11 = smov 0   ;;  %s571_s12 = smov 0  }
   0x6   :  { %s573_s13 = smov 0   ;;  %s575_s14 = smov 0  }
   0x7 LB: > { %s313_s15 = sadd.s32 4294967295, %s547_s14   ;;  %s314_s16 = sadd.s32 4294967294, %s547_s14   ;;  %s547_s14 = sphi %s575_s14, %s19_s14   ;;  %s543_s13 = sphi %s573_s13, %s728_s13   ;;  %s539_s12 = sphi %s571_s12, %s727_s12   ;;  %s535_s11 = sphi %s569_s11, %s726_s11   ;;  %s531_s10 = sphi %s567_s10, %s725_s10   ;;  %s527_s9 = sphi %s565_s9, %s724_s9  }
   0x8   : > { %p53_p0 = scmp.ne.s32.totalorder %s531_s10, %s527_s9  ;;  %p599_p1 = scmp.eq.s32.totalorder %s313_s15, 0 }
   0x9   : > { %p603_p2 = scmp.eq.s32.totalorder %s313_s15, 1  ;;  %p111_p3 = scmp.eq.s32.totalorder %s314_s16, 1 }
   0xa   : > { %p609_p4 = por %p599_p1, %p53_p0  ;;  %p315_p5 = scmp.ge.s32.totalorder %s547_s14, 1 }
   0xb   : > { %p614_p6 = por %p111_p3, %p53_p0  ;;  %p118_p7 = scmp.lt.s32.totalorder %s547_s14, 3 }
   0xc   : > { %s132_s23 = sshll.u32 %s715_s1, 4  ;;  %p317_p9 = scmp.ge.s32.totalorder %s547_s14, 2  ;;  %s133_s23 = int_to_ptr.hbm [resolvable:$true] %s132_s23 }
   0xd   : > { %p622_p8 = pnand %p315_p5, %p118_p7  ;;  %s549_s25 = smov [#allocation5]  }
   0xe   : > { %s134_s26 = sshll.u32 %s549_s25, 4  ;;  %s28_s27 = sadd.s32 1, %s543_s13  ;;  %s135_s26 = int_to_ptr.vmem [resolvable:$true] %s134_s26 }
   0xf   : > { %p336_p10 = pneg %p622_p8  ;;  %p29_p12 = scmp.ge.s32.totalorder %s28_s27, 2 }
  0x10   : > { %s40_s28 = sadd.s32 1, %s535_s11  ;;  %p47_p13 = scmp.ne.s32.totalorder %s535_s11, %s531_s10 }
  0x11   : > { %p337_p11 = pnand %p336_p10, %p599_p1  ;;  %p48_p0 = scmp.eq.s32.totalorder %s547_s14, 0 }
  0x12   : > { %s730_s27 = smov (%p29_p12, %s28_s27), 0  ;;  %p644_p5 = por %p603_p2, %p47_p13 }
  0x13   : > { %339 = dma.hbm_to_vmem [thread:$0]  (!%p337_p11), %s133_s23, 32, %s135_s26, [#allocation6]  }
  0x14   : > { %p638_p3 = por %p48_p0, %p47_p13  ;;  %s35_s3 = ssub.s32 %s543_s13, %s730_s27 }
  0x15   : > { %p349_p7 = scmp.lt.s32.totalorder %s547_s14, 2  ;;  %p38_p10 = scmp.eq.s32.totalorder %s35_s3, 0 }
  0x16   : > { %s145_s4 = sand.u32 1, %s535_s11   ;;  %s319_s7 = sshll.u32 %s543_s13, 1 }
  0x17   : > { %s318_s5 = sshll.u32 %s145_s4, 1  ;;  %s154_s16 = scalar_lea.hbm %s714_s0, %s319_s7 }
  0x18   : > { %s653_s6 = scalar_select %p38_p10, %s535_s11, %s40_s28  }
  0x19   : > { %s149_s21 = scalar_lea.vmem [#allocation2], %s318_s5  ;;  %s156_s18 = sshll.u32 %s154_s16, 4  ;;  %s157_s18 = int_to_ptr.hbm [resolvable:$true] %s156_s18 }
  0x1a   : > { %s158_s22 = sshll.u32 %s149_s21, 4  ;;  %p341_p2 = pnand %p349_p7, %p638_p3  ;;  %s159_s22 = int_to_ptr.vmem [resolvable:$true] %s158_s22 }
  0x1b   : > { %s146_s23 = scalar_lea.sflag [#allocation3], %s145_s4  ;;  %167 = sbr.rel (%p622_p8) target bundleno = 50 (0x32), region = 28 }
  0x1c   : > { %343 = dma.hbm_to_vmem [thread:$0]  (!%p341_p2), %s157_s18, 32, %s159_s22, %s146_s23  }
  0x1d   : > { %s664_s25 = sand.u32 (!%p622_p8), 1, %s531_s10  }
  0x1e   : > { %s321_s26 = sshll.u32 (!%p622_p8), %s664_s25, 1  ;;  %s170_s28 = scalar_lea.sflag (!%p622_p8), [#allocation3], %s664_s25 }
  0x1f   : > { %s173_s3 = scalar_lea.vmem (!%p622_p8), [#allocation2], %s321_s26 }
  0x20   : > { %514 = dma.done.wait (%p609_p4), %s170_s28, 32  }
  0x21   : > { %516 = vsyncadd (%p609_p4), %s170_s28, 4294967264 }
  0x22   : > { %518 = dma.done.wait (%p599_p1), [#allocation6], 32  }
  0x23   : > { %520 = vsyncadd (%p599_p1), [#allocation6], 4294967264  ;;  %s325_s24 = sshll.u32 %s539_s12, 1  ;;  %s199_s7 = scalar_lea.vmem [#allocation7], %s321_s26  ;;  %v200_v0 = vld [vmem:[%s173_s3] sm:$0x3] }
  0x24   : > { %s216_s5 = scalar_lea.hbm %s716_s2, %s325_s24  ;;  %s218_s8 = sshll.u32 %s199_s7, 4  ;;  %v201_v1 = vld [vmem:[#allocation5] sm:$0x3]  ;;  %s219_s8 = int_to_ptr.vmem [resolvable:$true] %s218_s8 }
  0x25   : > { %s220_s15 = sshll.u32 %s216_s5, 4  ;;  %v202_v2 = vadd.f32 %v201_v1, %v200_v0  ;;  %s205_s19 = scalar_lea.sflag [#allocation4], %s664_s25  ;;  %s221_s15 = int_to_ptr.hbm [resolvable:$true] %s220_s15 }
  0x26   : > { %s475_s17 = sshra.s32 %s221_s15, 4  ;;  %s481_s22 = scalar_lea.hbm %s716_s2, 4  ;;  %s476_s17 = int_to_ptr.hbm [resolvable:$true] %s475_s17 }
  0x27   : > { %203 = vst [vmem:[%s199_s7] sm:$0x3] %v202_v2  ;;  %s477_s16 = scalar_lea.hbm %s476_s17, 2  ;;  %p482_p11 = scmp.lt.s32.totalorder %s476_s17, %s716_s2 }
  0x28   : > { %p478_p1 = scmp.ne.s32.totalorder %s476_s17, %s477_s16  ;;  %p483_p12 = scmp.lt.s32.totalorder %s481_s22, %s477_s16 }
  0x2a   : > { %p479_p4 = pnand %p478_p1, %p644_p5  ;;  %p484_p13 = por %p483_p12, %p482_p11 }
  0x2c   : > { %p480_p8 = pneg %p479_p4 }
  0x2e   : > { %p485_p0 = pnand %p484_p13, %p480_p8 }
  0x30   : > { %488 = shalt.err (!%p485_p0)
}
  0x31   : > { %334 = dma.vmem_to_hbm [thread:$0]  (%p644_p5), %s219_s8, 32, %s221_s15, %s205_s19  }
  0x32 PF: > { %s232_s25 = sand.u32 1, %s527_s9   ;;  %p345_p3 = pnand %p317_p9, %p614_p6 }
  0x33   : > { %s233_s26 = scalar_lea.sflag [#allocation4], %s232_s25 }
  0x34   : > { %p346_p7 = pneg %p345_p3 }
  0x36   : > { %522 = dma.done.wait (%p346_p7), %s233_s26, 32  }
  0x37   : > { %524 = vsyncadd (%p346_p7), %s233_s26, 4294967264  ;;  %s19_s14 = sadd.s32 1, %s547_s14   ;;  %s724_s9 = smov %s531_s10 }
  0x38   : > { %p16_p10 = scmp.ge.s32.totalorder %s19_s14, 4   ;;  %s725_s10 = smov %s535_s11 }
  0x39   : > { %s726_s11 = smov %s653_s6  ;;  %s727_s12 = smov %s543_s13 }
  0x3a   : > { %s728_s13 = smov %s730_s27  ;;  %18 = sbr.rel (!%p16_p10) target bundleno = 7 (0x7), region = 78 }
  0x3f   :  { %239 = vsyncpa [#allocation3], 1 }
  0x40   :  { %241 = vsyncpa [#allocation3 + $0x1], 1 }
  0x41   :  { %242 = vsyncpa [#allocation6], 1 }
  0x42   :  { %243 = vsyncpa [#allocation4], 1 }
  0x43   :  { %245 = vsyncpa [#allocation4 + $0x1], 1 }

</bundles_post_ra>
